<compile_context>
chip_gen: v6e
topology: v6e:2x2x1
jax: 0.10.0
libtpu: 0.0.40
codegen_flags: <defaults>
</compile_context>

<pallas_src>
import functools

import jax
import jax.numpy as jnp
from jax.experimental import pallas as pl
from jax.experimental.pallas import tpu as pltpu


def _gather_group(idx_ref, tab_ref, out_ref, onehot_ref, *, n, B, V, D):
    """concat_f table[f][idx[f, :]] -> out_ref (B, n*D).

    idx_ref:    (n*B,) int32 SMEM   flat indices, feature-major
    tab_ref:    (n*V, D) f32 VMEM   per-feature tables flattened along rows
    out_ref:    (B, n*D) f32 VMEM   lane-concatenated output
    onehot_ref: (n*B, n*V) f32 VMEM scratch for the packed one-hot LHS
    """
    NV = n * V
    NB = n * B
    # Lane iota hoisted once per group (JAX does not CSE broadcast_in_dim).
    col = jax.lax.broadcasted_iota(jnp.int32, (1, NV), 1)
    # Build the packed one-hot LHS row by row from SMEM scalars.
    for r in range(NB):
        f = r // B
        s = idx_ref[r] + f * V  # row in the flattened (n*V, D) table
        onehot_ref[pl.ds(r, 1), :] = (col == s).astype(onehot_ref.dtype)
    # Single MXU matmul per group: (n*B, n*V) @ (n*V, D) -> (n*B, D).
    packed = jnp.dot(
        onehot_ref[...], tab_ref[...], preferred_element_type=jnp.float32
    )
    # Scatter feature blocks into the concatenated (B, n*D) layout.
    # Sublane offsets f*B (mult. of 8) and lane offsets f*D (mult. of 128)
    # keep loads/stores unmasked and tile-aligned.
    for f in range(n):
        out_ref[:, f * D:(f + 1) * D] = packed[f * B:(f + 1) * B, :].astype(
            out_ref.dtype
        )


def _global_local_kernel(
    g_idx_ref, l_idx_ref,            # scalar-prefetch (SMEM)
    g_tab_ref, l_tab_ref,            # VMEM inputs
    g_out_ref, l_out_ref,            # VMEM outputs
    g_onehot, l_onehot,              # VMEM scratch
    *, n_g, n_l, B, V_g, V_l, D_g, D_l,
):
    _gather_group(g_idx_ref, g_tab_ref, g_out_ref, g_onehot,
                  n=n_g, B=B, V=V_g, D=D_g)
    _gather_group(l_idx_ref, l_tab_ref, l_out_ref, l_onehot,
                  n=n_l, B=B, V=V_l, D=D_l)


def global_local_forward(g_idx, l_idx, g_tables, l_tables):
    """g_idx: (n_g, B) i32, g_tables: (n_g, V_g, D_g) f32 (same for local).

    Returns (global_out (B, n_g*D_g), local_out (B, n_l*D_l)).
    """
    n_g, B = g_idx.shape
    n_l, _ = l_idx.shape
    _, V_g, D_g = g_tables.shape
    _, V_l, D_l = l_tables.shape

    g_tab_flat = g_tables.reshape(n_g * V_g, D_g)
    l_tab_flat = l_tables.reshape(n_l * V_l, D_l)
    g_idx_flat = g_idx.reshape(n_g * B).astype(jnp.int32)
    l_idx_flat = l_idx.reshape(n_l * B).astype(jnp.int32)

    kernel = functools.partial(
        _global_local_kernel,
        n_g=n_g, n_l=n_l, B=B, V_g=V_g, V_l=V_l, D_g=D_g, D_l=D_l,
    )

    grid_spec = pltpu.PrefetchScalarGridSpec(
        num_scalar_prefetch=2,
        grid=(1,),
        in_specs=[
            pl.BlockSpec((n_g * V_g, D_g), lambda i, gi, li: (0, 0)),
            pl.BlockSpec((n_l * V_l, D_l), lambda i, gi, li: (0, 0)),
        ],
        out_specs=[
            pl.BlockSpec((B, n_g * D_g), lambda i, gi, li: (0, 0)),
            pl.BlockSpec((B, n_l * D_l), lambda i, gi, li: (0, 0)),
        ],
        scratch_shapes=[
            pltpu.VMEM((n_g * B, n_g * V_g), jnp.float32),
            pltpu.VMEM((n_l * B, n_l * V_l), jnp.float32),
        ],
    )

    return pl.pallas_call(
        kernel,
        out_shape=(
            jax.ShapeDtypeStruct((B, n_g * D_g), g_tables.dtype),
            jax.ShapeDtypeStruct((B, n_l * D_l), l_tables.dtype),
        ),
        grid_spec=grid_spec,
        compiler_params=pltpu.CompilerParams(
            dimension_semantics=("arbitrary",),
        ),
    )(g_idx_flat, l_idx_flat, g_tab_flat, l_tab_flat)


class GlobalLocalEmbeddingsPallas:
    """JAX/Pallas equivalent of GlobalLocalEmbeddings.

    forward(inputs) -> (global_embedding, local_embedding), each being the
    concatenation over that group's keys (sorted for determinism) of
    table[k][inputs[k]].
    """

    def __init__(self, global_tables, local_tables):
        self.global_keys = sorted(global_tables.keys())
        self.local_keys = sorted(local_tables.keys())
        # Stacking requires uniform (V, D) per group (see header comment).
        self.global_tables = jnp.stack(
            [global_tables[k] for k in self.global_keys], axis=0
        )
        self.local_tables = jnp.stack(
            [local_tables[k] for k in self.local_keys], axis=0
        )

    @property
    def output_dim(self):
        n_g, _, d_g = self.global_tables.shape
        n_l, _, d_l = self.local_tables.shape
        return (n_g * d_g, n_l * d_l)

    def keys(self):
        return list(self.global_keys) + list(self.local_keys)

    def __call__(self, inputs):
        g_idx = jnp.stack([inputs[k] for k in self.global_keys], axis=0)
        l_idx = jnp.stack([inputs[k] for k in self.local_keys], axis=0)
        return global_local_forward(
            g_idx, l_idx, self.global_tables, self.local_tables
        )


def _reference_group(inputs, keys, tables):
    parts = []
    for i, k in enumerate(keys):
        parts.append(jnp.take(tables[i], inputs[k], axis=0))
    return jnp.concatenate(parts, axis=-1)


if __name__ == "__main__":
    key = jax.random.PRNGKey(0)
    k_tab, k_idx = jax.random.split(key)

    B = 8                 # batch (multiple of 8)
    V_G, D_G = 64, 128    # global-group vocab / embedding dim
    V_L, D_L = 32, 128    # local-group  vocab / embedding dim

    global_keys = ["region", "user_id"]
    local_keys = ["category", "item_id"]

    # Deterministic parameter init (synthetic; no checkpoint loading).
    tkeys = jax.random.split(k_tab, len(global_keys) + len(local_keys))
    global_tables = {
        k: jax.random.normal(tk, (V_G, D_G), dtype=jnp.float32) * 0.02
        for k, tk in zip(global_keys, tkeys[: len(global_keys)])
    }
    local_tables = {
        k: jax.random.normal(tk, (V_L, D_L), dtype=jnp.float32) * 0.02
        for k, tk in zip(local_keys, tkeys[len(global_keys):])
    }

    # Deterministic example inputs: one index vector per feature key.
    ikeys = jax.random.split(k_idx, len(global_keys) + len(local_keys))
    inputs = {}
    for k, ik in zip(global_keys, ikeys[: len(global_keys)]):
        inputs[k] = jax.random.randint(ik, (B,), 0, V_G, dtype=jnp.int32)
    for k, ik in zip(local_keys, ikeys[len(global_keys):]):
        inputs[k] = jax.random.randint(ik, (B,), 0, V_L, dtype=jnp.int32)

    model = GlobalLocalEmbeddingsPallas(global_tables, local_tables)
    g_out, l_out = model(inputs)
    g_out = jax.block_until_ready(g_out)
    l_out = jax.block_until_ready(l_out)

    # Pure-JAX reference check.
    g_ref = _reference_group(inputs, model.global_keys, model.global_tables)
    l_ref = _reference_group(inputs, model.local_keys, model.local_tables)
    assert g_out.shape == (B, len(global_keys) * D_G)
    assert l_out.shape == (B, len(local_keys) * D_L)
    assert jnp.allclose(g_out, g_ref, atol=1e-6)
    assert jnp.allclose(l_out, l_ref, atol=1e-6)

    print("KERNEL_OK")
</pallas_src>

<mosaic_0001>
module attributes {stable_mosaic.version = 11 : i64} {
  func.func @_global_local_kernel(%arg0: i32, %arg1: memref<16xi32, #tpu.memory_space<smem>>, %arg2: memref<16xi32, #tpu.memory_space<smem>>, %arg3: memref<128x128xf32, #tpu.memory_space<vmem>>, %arg4: memref<64x128xf32, #tpu.memory_space<vmem>>, %arg5: memref<8x256xf32, #tpu.memory_space<vmem>>, %arg6: memref<8x256xf32, #tpu.memory_space<vmem>>, %arg7: memref<16x128xf32, #tpu.memory_space<vmem>>, %arg8: memref<16x64xf32, #tpu.memory_space<vmem>>) attributes {dimension_semantics = [#tpu.dimension_semantics<arbitrary>], iteration_bounds = array<i64: 1>, scalar_prefetch = 2 : i64, scratch_operands = 2 : i64, tpu.core_type = #tpu.core_type<tc>, window_params = [{pipeline_mode = #tpu.pipeline_mode<synchronous>, transform_indices = @transform_0, window_bounds = array<i64: 128, 128>}, {pipeline_mode = #tpu.pipeline_mode<synchronous>, transform_indices = @transform_1, window_bounds = array<i64: 64, 128>}, {pipeline_mode = #tpu.pipeline_mode<synchronous>, transform_indices = @transform_2, window_bounds = array<i64: 8, 256>}, {pipeline_mode = #tpu.pipeline_mode<synchronous>, transform_indices = @transform_3, window_bounds = array<i64: 8, 256>}]} {
    %0 = tpu.iota {dimensions = array<i32: 1>} : vector<1x128xi32>
    %c0 = arith.constant 0 : index
    %1 = memref.load %arg1[%c0] : memref<16xi32, #tpu.memory_space<smem>>
    %c0_i32 = arith.constant 0 : i32
    %2 = arith.addi %1, %c0_i32 : i32
    %3 = vector.broadcast %2 : i32 to vector<1x128xi32>
    %4 = arith.cmpi eq, %0, %3 : vector<1x128xi32>
    %5 = arith.extui %4 : vector<1x128xi1> to vector<1x128xi32>
    %6 = arith.sitofp %5 : vector<1x128xi32> to vector<1x128xf32>
    %c0_0 = arith.constant 0 : index
    %c0_1 = arith.constant 0 : index
    %7 = vector.load %arg7[%c0_0, %c0_1] : memref<16x128xf32, #tpu.memory_space<vmem>>, vector<1x128xf32>
    tpu.vector_store %arg7[%c0_0, %c0_1], %6 {strides = array<i32>} : memref<16x128xf32, #tpu.memory_space<vmem>>, vector<1x128xf32>,
    %c1 = arith.constant 1 : index
    %8 = memref.load %arg1[%c1] : memref<16xi32, #tpu.memory_space<smem>>
    %c0_i32_2 = arith.constant 0 : i32
    %9 = arith.addi %8, %c0_i32_2 : i32
    %10 = vector.broadcast %9 : i32 to vector<1x128xi32>
    %11 = arith.cmpi eq, %0, %10 : vector<1x128xi32>
    %12 = arith.extui %11 : vector<1x128xi1> to vector<1x128xi32>
    %13 = arith.sitofp %12 : vector<1x128xi32> to vector<1x128xf32>
    %c1_3 = arith.constant 1 : index
    %c0_4 = arith.constant 0 : index
    %14 = vector.load %arg7[%c1_3, %c0_4] : memref<16x128xf32, #tpu.memory_space<vmem>>, vector<1x128xf32>
    tpu.vector_store %arg7[%c1_3, %c0_4], %13 {strides = array<i32>} : memref<16x128xf32, #tpu.memory_space<vmem>>, vector<1x128xf32>,
    %c2 = arith.constant 2 : index
    %15 = memref.load %arg1[%c2] : memref<16xi32, #tpu.memory_space<smem>>
    %c0_i32_5 = arith.constant 0 : i32
    %16 = arith.addi %15, %c0_i32_5 : i32
    %17 = vector.broadcast %16 : i32 to vector<1x128xi32>
    %18 = arith.cmpi eq, %0, %17 : vector<1x128xi32>
    %19 = arith.extui %18 : vector<1x128xi1> to vector<1x128xi32>
    %20 = arith.sitofp %19 : vector<1x128xi32> to vector<1x128xf32>
    %c2_6 = arith.constant 2 : index
    %c0_7 = arith.constant 0 : index
    %21 = vector.load %arg7[%c2_6, %c0_7] : memref<16x128xf32, #tpu.memory_space<vmem>>, vector<1x128xf32>
    tpu.vector_store %arg7[%c2_6, %c0_7], %20 {strides = array<i32>} : memref<16x128xf32, #tpu.memory_space<vmem>>, vector<1x128xf32>,
    %c3 = arith.constant 3 : index
    %22 = memref.load %arg1[%c3] : memref<16xi32, #tpu.memory_space<smem>>
    %c0_i32_8 = arith.constant 0 : i32
    %23 = arith.addi %22, %c0_i32_8 : i32
    %24 = vector.broadcast %23 : i32 to vector<1x128xi32>
    %25 = arith.cmpi eq, %0, %24 : vector<1x128xi32>
    %26 = arith.extui %25 : vector<1x128xi1> to vector<1x128xi32>
    %27 = arith.sitofp %26 : vector<1x128xi32> to vector<1x128xf32>
    %c3_9 = arith.constant 3 : index
    %c0_10 = arith.constant 0 : index
    %28 = vector.load %arg7[%c3_9, %c0_10] : memref<16x128xf32, #tpu.memory_space<vmem>>, vector<1x128xf32>
    tpu.vector_store %arg7[%c3_9, %c0_10], %27 {strides = array<i32>} : memref<16x128xf32, #tpu.memory_space<vmem>>, vector<1x128xf32>,
    %c4 = arith.constant 4 : index
    %29 = memref.load %arg1[%c4] : memref<16xi32, #tpu.memory_space<smem>>
    %c0_i32_11 = arith.constant 0 : i32
    %30 = arith.addi %29, %c0_i32_11 : i32
    %31 = vector.broadcast %30 : i32 to vector<1x128xi32>
    %32 = arith.cmpi eq, %0, %31 : vector<1x128xi32>
    %33 = arith.extui %32 : vector<1x128xi1> to vector<1x128xi32>
    %34 = arith.sitofp %33 : vector<1x128xi32> to vector<1x128xf32>
    %c4_12 = arith.constant 4 : index
    %c0_13 = arith.constant 0 : index
    %35 = vector.load %arg7[%c4_12, %c0_13] : memref<16x128xf32, #tpu.memory_space<vmem>>, vector<1x128xf32>
    tpu.vector_store %arg7[%c4_12, %c0_13], %34 {strides = array<i32>} : memref<16x128xf32, #tpu.memory_space<vmem>>, vector<1x128xf32>,
    %c5 = arith.constant 5 : index
    %36 = memref.load %arg1[%c5] : memref<16xi32, #tpu.memory_space<smem>>
    %c0_i32_14 = arith.constant 0 : i32
    %37 = arith.addi %36, %c0_i32_14 : i32
    %38 = vector.broadcast %37 : i32 to vector<1x128xi32>
    %39 = arith.cmpi eq, %0, %38 : vector<1x128xi32>
    %40 = arith.extui %39 : vector<1x128xi1> to vector<1x128xi32>
    %41 = arith.sitofp %40 : vector<1x128xi32> to vector<1x128xf32>
    %c5_15 = arith.constant 5 : index
    %c0_16 = arith.constant 0 : index
    %42 = vector.load %arg7[%c5_15, %c0_16] : memref<16x128xf32, #tpu.memory_space<vmem>>, vector<1x128xf32>
    tpu.vector_store %arg7[%c5_15, %c0_16], %41 {strides = array<i32>} : memref<16x128xf32, #tpu.memory_space<vmem>>, vector<1x128xf32>,
    %c6 = arith.constant 6 : index
    %43 = memref.load %arg1[%c6] : memref<16xi32, #tpu.memory_space<smem>>
    %c0_i32_17 = arith.constant 0 : i32
    %44 = arith.addi %43, %c0_i32_17 : i32
    %45 = vector.broadcast %44 : i32 to vector<1x128xi32>
    %46 = arith.cmpi eq, %0, %45 : vector<1x128xi32>
    %47 = arith.extui %46 : vector<1x128xi1> to vector<1x128xi32>
    %48 = arith.sitofp %47 : vector<1x128xi32> to vector<1x128xf32>
    %c6_18 = arith.constant 6 : index
    %c0_19 = arith.constant 0 : index
    %49 = vector.load %arg7[%c6_18, %c0_19] : memref<16x128xf32, #tpu.memory_space<vmem>>, vector<1x128xf32>
    tpu.vector_store %arg7[%c6_18, %c0_19], %48 {strides = array<i32>} : memref<16x128xf32, #tpu.memory_space<vmem>>, vector<1x128xf32>,
    %c7 = arith.constant 7 : index
    %50 = memref.load %arg1[%c7] : memref<16xi32, #tpu.memory_space<smem>>
    %c0_i32_20 = arith.constant 0 : i32
    %51 = arith.addi %50, %c0_i32_20 : i32
    %52 = vector.broadcast %51 : i32 to vector<1x128xi32>
    %53 = arith.cmpi eq, %0, %52 : vector<1x128xi32>
    %54 = arith.extui %53 : vector<1x128xi1> to vector<1x128xi32>
    %55 = arith.sitofp %54 : vector<1x128xi32> to vector<1x128xf32>
    %c7_21 = arith.constant 7 : index
    %c0_22 = arith.constant 0 : index
    %56 = vector.load %arg7[%c7_21, %c0_22] : memref<16x128xf32, #tpu.memory_space<vmem>>, vector<1x128xf32>
    tpu.vector_store %arg7[%c7_21, %c0_22], %55 {strides = array<i32>} : memref<16x128xf32, #tpu.memory_space<vmem>>, vector<1x128xf32>,
    %c8 = arith.constant 8 : index
    %57 = memref.load %arg1[%c8] : memref<16xi32, #tpu.memory_space<smem>>
    %c64_i32 = arith.constant 64 : i32
    %58 = arith.addi %57, %c64_i32 : i32
    %59 = vector.broadcast %58 : i32 to vector<1x128xi32>
    %60 = arith.cmpi eq, %0, %59 : vector<1x128xi32>
    %61 = arith.extui %60 : vector<1x128xi1> to vector<1x128xi32>
    %62 = arith.sitofp %61 : vector<1x128xi32> to vector<1x128xf32>
    %c8_23 = arith.constant 8 : index
    %c0_24 = arith.constant 0 : index
    %63 = vector.load %arg7[%c8_23, %c0_24] : memref<16x128xf32, #tpu.memory_space<vmem>>, vector<1x128xf32>
    tpu.vector_store %arg7[%c8_23, %c0_24], %62 {strides = array<i32>} : memref<16x128xf32, #tpu.memory_space<vmem>>, vector<1x128xf32>,
    %c9 = arith.constant 9 : index
    %64 = memref.load %arg1[%c9] : memref<16xi32, #tpu.memory_space<smem>>
    %c64_i32_25 = arith.constant 64 : i32
    %65 = arith.addi %64, %c64_i32_25 : i32
    %66 = vector.broadcast %65 : i32 to vector<1x128xi32>
    %67 = arith.cmpi eq, %0, %66 : vector<1x128xi32>
    %68 = arith.extui %67 : vector<1x128xi1> to vector<1x128xi32>
    %69 = arith.sitofp %68 : vector<1x128xi32> to vector<1x128xf32>
    %c9_26 = arith.constant 9 : index
    %c0_27 = arith.constant 0 : index
    %70 = vector.load %arg7[%c9_26, %c0_27] : memref<16x128xf32, #tpu.memory_space<vmem>>, vector<1x128xf32>
    tpu.vector_store %arg7[%c9_26, %c0_27], %69 {strides = array<i32>} : memref<16x128xf32, #tpu.memory_space<vmem>>, vector<1x128xf32>,
    %c10 = arith.constant 10 : index
    %71 = memref.load %arg1[%c10] : memref<16xi32, #tpu.memory_space<smem>>
    %c64_i32_28 = arith.constant 64 : i32
    %72 = arith.addi %71, %c64_i32_28 : i32
    %73 = vector.broadcast %72 : i32 to vector<1x128xi32>
    %74 = arith.cmpi eq, %0, %73 : vector<1x128xi32>
    %75 = arith.extui %74 : vector<1x128xi1> to vector<1x128xi32>
    %76 = arith.sitofp %75 : vector<1x128xi32> to vector<1x128xf32>
    %c10_29 = arith.constant 10 : index
    %c0_30 = arith.constant 0 : index
    %77 = vector.load %arg7[%c10_29, %c0_30] : memref<16x128xf32, #tpu.memory_space<vmem>>, vector<1x128xf32>
    tpu.vector_store %arg7[%c10_29, %c0_30], %76 {strides = array<i32>} : memref<16x128xf32, #tpu.memory_space<vmem>>, vector<1x128xf32>,
    %c11 = arith.constant 11 : index
    %78 = memref.load %arg1[%c11] : memref<16xi32, #tpu.memory_space<smem>>
    %c64_i32_31 = arith.constant 64 : i32
    %79 = arith.addi %78, %c64_i32_31 : i32
    %80 = vector.broadcast %79 : i32 to vector<1x128xi32>
    %81 = arith.cmpi eq, %0, %80 : vector<1x128xi32>
    %82 = arith.extui %81 : vector<1x128xi1> to vector<1x128xi32>
    %83 = arith.sitofp %82 : vector<1x128xi32> to vector<1x128xf32>
    %c11_32 = arith.constant 11 : index
    %c0_33 = arith.constant 0 : index
    %84 = vector.load %arg7[%c11_32, %c0_33] : memref<16x128xf32, #tpu.memory_space<vmem>>, vector<1x128xf32>
    tpu.vector_store %arg7[%c11_32, %c0_33], %83 {strides = array<i32>} : memref<16x128xf32, #tpu.memory_space<vmem>>, vector<1x128xf32>,
    %c12 = arith.constant 12 : index
    %85 = memref.load %arg1[%c12] : memref<16xi32, #tpu.memory_space<smem>>
    %c64_i32_34 = arith.constant 64 : i32
    %86 = arith.addi %85, %c64_i32_34 : i32
    %87 = vector.broadcast %86 : i32 to vector<1x128xi32>
    %88 = arith.cmpi eq, %0, %87 : vector<1x128xi32>
    %89 = arith.extui %88 : vector<1x128xi1> to vector<1x128xi32>
    %90 = arith.sitofp %89 : vector<1x128xi32> to vector<1x128xf32>
    %c12_35 = arith.constant 12 : index
    %c0_36 = arith.constant 0 : index
    %91 = vector.load %arg7[%c12_35, %c0_36] : memref<16x128xf32, #tpu.memory_space<vmem>>, vector<1x128xf32>
    tpu.vector_store %arg7[%c12_35, %c0_36], %90 {strides = array<i32>} : memref<16x128xf32, #tpu.memory_space<vmem>>, vector<1x128xf32>,
    %c13 = arith.constant 13 : index
    %92 = memref.load %arg1[%c13] : memref<16xi32, #tpu.memory_space<smem>>
    %c64_i32_37 = arith.constant 64 : i32
    %93 = arith.addi %92, %c64_i32_37 : i32
    %94 = vector.broadcast %93 : i32 to vector<1x128xi32>
    %95 = arith.cmpi eq, %0, %94 : vector<1x128xi32>
    %96 = arith.extui %95 : vector<1x128xi1> to vector<1x128xi32>
    %97 = arith.sitofp %96 : vector<1x128xi32> to vector<1x128xf32>
    %c13_38 = arith.constant 13 : index
    %c0_39 = arith.constant 0 : index
    %98 = vector.load %arg7[%c13_38, %c0_39] : memref<16x128xf32, #tpu.memory_space<vmem>>, vector<1x128xf32>
    tpu.vector_store %arg7[%c13_38, %c0_39], %97 {strides = array<i32>} : memref<16x128xf32, #tpu.memory_space<vmem>>, vector<1x128xf32>,
    %c14 = arith.constant 14 : index
    %99 = memref.load %arg1[%c14] : memref<16xi32, #tpu.memory_space<smem>>
    %c64_i32_40 = arith.constant 64 : i32
    %100 = arith.addi %99, %c64_i32_40 : i32
    %101 = vector.broadcast %100 : i32 to vector<1x128xi32>
    %102 = arith.cmpi eq, %0, %101 : vector<1x128xi32>
    %103 = arith.extui %102 : vector<1x128xi1> to vector<1x128xi32>
    %104 = arith.sitofp %103 : vector<1x128xi32> to vector<1x128xf32>
    %c14_41 = arith.constant 14 : index
    %c0_42 = arith.constant 0 : index
    %105 = vector.load %arg7[%c14_41, %c0_42] : memref<16x128xf32, #tpu.memory_space<vmem>>, vector<1x128xf32>
    tpu.vector_store %arg7[%c14_41, %c0_42], %104 {strides = array<i32>} : memref<16x128xf32, #tpu.memory_space<vmem>>, vector<1x128xf32>,
    %c15 = arith.constant 15 : index
    %106 = memref.load %arg1[%c15] : memref<16xi32, #tpu.memory_space<smem>>
    %c64_i32_43 = arith.constant 64 : i32
    %107 = arith.addi %106, %c64_i32_43 : i32
    %108 = vector.broadcast %107 : i32 to vector<1x128xi32>
    %109 = arith.cmpi eq, %0, %108 : vector<1x128xi32>
    %110 = arith.extui %109 : vector<1x128xi1> to vector<1x128xi32>
    %111 = arith.sitofp %110 : vector<1x128xi32> to vector<1x128xf32>
    %c15_44 = arith.constant 15 : index
    %c0_45 = arith.constant 0 : index
    %112 = vector.load %arg7[%c15_44, %c0_45] : memref<16x128xf32, #tpu.memory_space<vmem>>, vector<1x128xf32>
    tpu.vector_store %arg7[%c15_44, %c0_45], %111 {strides = array<i32>} : memref<16x128xf32, #tpu.memory_space<vmem>>, vector<1x128xf32>,
    %c0_46 = arith.constant 0 : index
    %c0_47 = arith.constant 0 : index
    %113 = vector.load %arg7[%c0_46, %c0_47] : memref<16x128xf32, #tpu.memory_space<vmem>>, vector<16x128xf32>
    %c0_48 = arith.constant 0 : index
    %c0_49 = arith.constant 0 : index
    %114 = vector.load %arg3[%c0_48, %c0_49] : memref<128x128xf32, #tpu.memory_space<vmem>>, vector<128x128xf32>
    %cst = arith.constant dense<0.000000e+00> : vector<16x128xf32>
    %115 = tpu.matmul %113, %114, %cst {dimension_numbers = #tpu.dot_dimension_numbers<[1], [0], [0], [1], [0, 0, 1, 1], [], []>} : vector<16x128xf32>, vector<128x128xf32>, vector<16x128xf32> -> vector<16x128xf32>
    %116 = vector.extract_strided_slice %115 {offsets = [0, 0], sizes = [8, 128], strides = [1, 1]} : vector<16x128xf32> to vector<8x128xf32>
    %c0_50 = arith.constant 0 : index
    %c0_51 = arith.constant 0 : index
    %117 = vector.load %arg5[%c0_50, %c0_51] : memref<8x256xf32, #tpu.memory_space<vmem>>, vector<8x128xf32>
    tpu.vector_store %arg5[%c0_50, %c0_51], %116 {strides = array<i32>} : memref<8x256xf32, #tpu.memory_space<vmem>>, vector<8x128xf32>,
    %118 = vector.extract_strided_slice %115 {offsets = [8, 0], sizes = [8, 128], strides = [1, 1]} : vector<16x128xf32> to vector<8x128xf32>
    %c0_52 = arith.constant 0 : index
    %c128 = arith.constant 128 : index
    %119 = vector.load %arg5[%c0_52, %c128] : memref<8x256xf32, #tpu.memory_space<vmem>>, vector<8x128xf32>
    tpu.vector_store %arg5[%c0_52, %c128], %118 {strides = array<i32>} : memref<8x256xf32, #tpu.memory_space<vmem>>, vector<8x128xf32>,
    %120 = tpu.iota {dimensions = array<i32: 1>} : vector<1x64xi32>
    %c0_53 = arith.constant 0 : index
    %121 = memref.load %arg2[%c0_53] : memref<16xi32, #tpu.memory_space<smem>>
    %c0_i32_54 = arith.constant 0 : i32
    %122 = arith.addi %121, %c0_i32_54 : i32
    %123 = vector.broadcast %122 : i32 to vector<1x64xi32>
    %124 = arith.cmpi eq, %120, %123 : vector<1x64xi32>
    %125 = arith.extui %124 : vector<1x64xi1> to vector<1x64xi32>
    %126 = arith.sitofp %125 : vector<1x64xi32> to vector<1x64xf32>
    %c0_55 = arith.constant 0 : index
    %c0_56 = arith.constant 0 : index
    %127 = vector.load %arg8[%c0_55, %c0_56] : memref<16x64xf32, #tpu.memory_space<vmem>>, vector<1x64xf32>
    tpu.vector_store %arg8[%c0_55, %c0_56], %126 {strides = array<i32>} : memref<16x64xf32, #tpu.memory_space<vmem>>, vector<1x64xf32>,
    %c1_57 = arith.constant 1 : index
    %128 = memref.load %arg2[%c1_57] : memref<16xi32, #tpu.memory_space<smem>>
    %c0_i32_58 = arith.constant 0 : i32
    %129 = arith.addi %128, %c0_i32_58 : i32
    %130 = vector.broadcast %129 : i32 to vector<1x64xi32>
    %131 = arith.cmpi eq, %120, %130 : vector<1x64xi32>
    %132 = arith.extui %131 : vector<1x64xi1> to vector<1x64xi32>
    %133 = arith.sitofp %132 : vector<1x64xi32> to vector<1x64xf32>
    %c1_59 = arith.constant 1 : index
    %c0_60 = arith.constant 0 : index
    %134 = vector.load %arg8[%c1_59, %c0_60] : memref<16x64xf32, #tpu.memory_space<vmem>>, vector<1x64xf32>
    tpu.vector_store %arg8[%c1_59, %c0_60], %133 {strides = array<i32>} : memref<16x64xf32, #tpu.memory_space<vmem>>, vector<1x64xf32>,
    %c2_61 = arith.constant 2 : index
    %135 = memref.load %arg2[%c2_61] : memref<16xi32, #tpu.memory_space<smem>>
    %c0_i32_62 = arith.constant 0 : i32
    %136 = arith.addi %135, %c0_i32_62 : i32
    %137 = vector.broadcast %136 : i32 to vector<1x64xi32>
    %138 = arith.cmpi eq, %120, %137 : vector<1x64xi32>
    %139 = arith.extui %138 : vector<1x64xi1> to vector<1x64xi32>
    %140 = arith.sitofp %139 : vector<1x64xi32> to vector<1x64xf32>
    %c2_63 = arith.constant 2 : index
    %c0_64 = arith.constant 0 : index
    %141 = vector.load %arg8[%c2_63, %c0_64] : memref<16x64xf32, #tpu.memory_space<vmem>>, vector<1x64xf32>
    tpu.vector_store %arg8[%c2_63, %c0_64], %140 {strides = array<i32>} : memref<16x64xf32, #tpu.memory_space<vmem>>, vector<1x64xf32>,
    %c3_65 = arith.constant 3 : index
    %142 = memref.load %arg2[%c3_65] : memref<16xi32, #tpu.memory_space<smem>>
    %c0_i32_66 = arith.constant 0 : i32
    %143 = arith.addi %142, %c0_i32_66 : i32
    %144 = vector.broadcast %143 : i32 to vector<1x64xi32>
    %145 = arith.cmpi eq, %120, %144 : vector<1x64xi32>
    %146 = arith.extui %145 : vector<1x64xi1> to vector<1x64xi32>
    %147 = arith.sitofp %146 : vector<1x64xi32> to vector<1x64xf32>
    %c3_67 = arith.constant 3 : index
    %c0_68 = arith.constant 0 : index
    %148 = vector.load %arg8[%c3_67, %c0_68] : memref<16x64xf32, #tpu.memory_space<vmem>>, vector<1x64xf32>
    tpu.vector_store %arg8[%c3_67, %c0_68], %147 {strides = array<i32>} : memref<16x64xf32, #tpu.memory_space<vmem>>, vector<1x64xf32>,
    %c4_69 = arith.constant 4 : index
    %149 = memref.load %arg2[%c4_69] : memref<16xi32, #tpu.memory_space<smem>>
    %c0_i32_70 = arith.constant 0 : i32
    %150 = arith.addi %149, %c0_i32_70 : i32
    %151 = vector.broadcast %150 : i32 to vector<1x64xi32>
    %152 = arith.cmpi eq, %120, %151 : vector<1x64xi32>
    %153 = arith.extui %152 : vector<1x64xi1> to vector<1x64xi32>
    %154 = arith.sitofp %153 : vector<1x64xi32> to vector<1x64xf32>
    %c4_71 = arith.constant 4 : index
    %c0_72 = arith.constant 0 : index
    %155 = vector.load %arg8[%c4_71, %c0_72] : memref<16x64xf32, #tpu.memory_space<vmem>>, vector<1x64xf32>
    tpu.vector_store %arg8[%c4_71, %c0_72], %154 {strides = array<i32>} : memref<16x64xf32, #tpu.memory_space<vmem>>, vector<1x64xf32>,
    %c5_73 = arith.constant 5 : index
    %156 = memref.load %arg2[%c5_73] : memref<16xi32, #tpu.memory_space<smem>>
    %c0_i32_74 = arith.constant 0 : i32
    %157 = arith.addi %156, %c0_i32_74 : i32
    %158 = vector.broadcast %157 : i32 to vector<1x64xi32>
    %159 = arith.cmpi eq, %120, %158 : vector<1x64xi32>
    %160 = arith.extui %159 : vector<1x64xi1> to vector<1x64xi32>
    %161 = arith.sitofp %160 : vector<1x64xi32> to vector<1x64xf32>
    %c5_75 = arith.constant 5 : index
    %c0_76 = arith.constant 0 : index
    %162 = vector.load %arg8[%c5_75, %c0_76] : memref<16x64xf32, #tpu.memory_space<vmem>>, vector<1x64xf32>
    tpu.vector_store %arg8[%c5_75, %c0_76], %161 {strides = array<i32>} : memref<16x64xf32, #tpu.memory_space<vmem>>, vector<1x64xf32>,
    %c6_77 = arith.constant 6 : index
    %163 = memref.load %arg2[%c6_77] : memref<16xi32, #tpu.memory_space<smem>>
    %c0_i32_78 = arith.constant 0 : i32
    %164 = arith.addi %163, %c0_i32_78 : i32
    %165 = vector.broadcast %164 : i32 to vector<1x64xi32>
    %166 = arith.cmpi eq, %120, %165 : vector<1x64xi32>
    %167 = arith.extui %166 : vector<1x64xi1> to vector<1x64xi32>
    %168 = arith.sitofp %167 : vector<1x64xi32> to vector<1x64xf32>
    %c6_79 = arith.constant 6 : index
    %c0_80 = arith.constant 0 : index
    %169 = vector.load %arg8[%c6_79, %c0_80] : memref<16x64xf32, #tpu.memory_space<vmem>>, vector<1x64xf32>
    tpu.vector_store %arg8[%c6_79, %c0_80], %168 {strides = array<i32>} : memref<16x64xf32, #tpu.memory_space<vmem>>, vector<1x64xf32>,
    %c7_81 = arith.constant 7 : index
    %170 = memref.load %arg2[%c7_81] : memref<16xi32, #tpu.memory_space<smem>>
    %c0_i32_82 = arith.constant 0 : i32
    %171 = arith.addi %170, %c0_i32_82 : i32
    %172 = vector.broadcast %171 : i32 to vector<1x64xi32>
    %173 = arith.cmpi eq, %120, %172 : vector<1x64xi32>
    %174 = arith.extui %173 : vector<1x64xi1> to vector<1x64xi32>
    %175 = arith.sitofp %174 : vector<1x64xi32> to vector<1x64xf32>
    %c7_83 = arith.constant 7 : index
    %c0_84 = arith.constant 0 : index
    %176 = vector.load %arg8[%c7_83, %c0_84] : memref<16x64xf32, #tpu.memory_space<vmem>>, vector<1x64xf32>
    tpu.vector_store %arg8[%c7_83, %c0_84], %175 {strides = array<i32>} : memref<16x64xf32, #tpu.memory_space<vmem>>, vector<1x64xf32>,
    %c8_85 = arith.constant 8 : index
    %177 = memref.load %arg2[%c8_85] : memref<16xi32, #tpu.memory_space<smem>>
    %c32_i32 = arith.constant 32 : i32
    %178 = arith.addi %177, %c32_i32 : i32
    %179 = vector.broadcast %178 : i32 to vector<1x64xi32>
    %180 = arith.cmpi eq, %120, %179 : vector<1x64xi32>
    %181 = arith.extui %180 : vector<1x64xi1> to vector<1x64xi32>
    %182 = arith.sitofp %181 : vector<1x64xi32> to vector<1x64xf32>
    %c8_86 = arith.constant 8 : index
    %c0_87 = arith.constant 0 : index
    %183 = vector.load %arg8[%c8_86, %c0_87] : memref<16x64xf32, #tpu.memory_space<vmem>>, vector<1x64xf32>
    tpu.vector_store %arg8[%c8_86, %c0_87], %182 {strides = array<i32>} : memref<16x64xf32, #tpu.memory_space<vmem>>, vector<1x64xf32>,
    %c9_88 = arith.constant 9 : index
    %184 = memref.load %arg2[%c9_88] : memref<16xi32, #tpu.memory_space<smem>>
    %c32_i32_89 = arith.constant 32 : i32
    %185 = arith.addi %184, %c32_i32_89 : i32
    %186 = vector.broadcast %185 : i32 to vector<1x64xi32>
    %187 = arith.cmpi eq, %120, %186 : vector<1x64xi32>
    %188 = arith.extui %187 : vector<1x64xi1> to vector<1x64xi32>
    %189 = arith.sitofp %188 : vector<1x64xi32> to vector<1x64xf32>
    %c9_90 = arith.constant 9 : index
    %c0_91 = arith.constant 0 : index
    %190 = vector.load %arg8[%c9_90, %c0_91] : memref<16x64xf32, #tpu.memory_space<vmem>>, vector<1x64xf32>
    tpu.vector_store %arg8[%c9_90, %c0_91], %189 {strides = array<i32>} : memref<16x64xf32, #tpu.memory_space<vmem>>, vector<1x64xf32>,
    %c10_92 = arith.constant 10 : index
    %191 = memref.load %arg2[%c10_92] : memref<16xi32, #tpu.memory_space<smem>>
    %c32_i32_93 = arith.constant 32 : i32
    %192 = arith.addi %191, %c32_i32_93 : i32
    %193 = vector.broadcast %192 : i32 to vector<1x64xi32>
    %194 = arith.cmpi eq, %120, %193 : vector<1x64xi32>
    %195 = arith.extui %194 : vector<1x64xi1> to vector<1x64xi32>
    %196 = arith.sitofp %195 : vector<1x64xi32> to vector<1x64xf32>
    %c10_94 = arith.constant 10 : index
    %c0_95 = arith.constant 0 : index
    %197 = vector.load %arg8[%c10_94, %c0_95] : memref<16x64xf32, #tpu.memory_space<vmem>>, vector<1x64xf32>
    tpu.vector_store %arg8[%c10_94, %c0_95], %196 {strides = array<i32>} : memref<16x64xf32, #tpu.memory_space<vmem>>, vector<1x64xf32>,
    %c11_96 = arith.constant 11 : index
    %198 = memref.load %arg2[%c11_96] : memref<16xi32, #tpu.memory_space<smem>>
    %c32_i32_97 = arith.constant 32 : i32
    %199 = arith.addi %198, %c32_i32_97 : i32
    %200 = vector.broadcast %199 : i32 to vector<1x64xi32>
    %201 = arith.cmpi eq, %120, %200 : vector<1x64xi32>
    %202 = arith.extui %201 : vector<1x64xi1> to vector<1x64xi32>
    %203 = arith.sitofp %202 : vector<1x64xi32> to vector<1x64xf32>
    %c11_98 = arith.constant 11 : index
    %c0_99 = arith.constant 0 : index
    %204 = vector.load %arg8[%c11_98, %c0_99] : memref<16x64xf32, #tpu.memory_space<vmem>>, vector<1x64xf32>
    tpu.vector_store %arg8[%c11_98, %c0_99], %203 {strides = array<i32>} : memref<16x64xf32, #tpu.memory_space<vmem>>, vector<1x64xf32>,
    %c12_100 = arith.constant 12 : index
    %205 = memref.load %arg2[%c12_100] : memref<16xi32, #tpu.memory_space<smem>>
    %c32_i32_101 = arith.constant 32 : i32
    %206 = arith.addi %205, %c32_i32_101 : i32
    %207 = vector.broadcast %206 : i32 to vector<1x64xi32>
    %208 = arith.cmpi eq, %120, %207 : vector<1x64xi32>
    %209 = arith.extui %208 : vector<1x64xi1> to vector<1x64xi32>
    %210 = arith.sitofp %209 : vector<1x64xi32> to vector<1x64xf32>
    %c12_102 = arith.constant 12 : index
    %c0_103 = arith.constant 0 : index
    %211 = vector.load %arg8[%c12_102, %c0_103] : memref<16x64xf32, #tpu.memory_space<vmem>>, vector<1x64xf32>
    tpu.vector_store %arg8[%c12_102, %c0_103], %210 {strides = array<i32>} : memref<16x64xf32, #tpu.memory_space<vmem>>, vector<1x64xf32>,
    %c13_104 = arith.constant 13 : index
    %212 = memref.load %arg2[%c13_104] : memref<16xi32, #tpu.memory_space<smem>>
    %c32_i32_105 = arith.constant 32 : i32
    %213 = arith.addi %212, %c32_i32_105 : i32
    %214 = vector.broadcast %213 : i32 to vector<1x64xi32>
    %215 = arith.cmpi eq, %120, %214 : vector<1x64xi32>
    %216 = arith.extui %215 : vector<1x64xi1> to vector<1x64xi32>
    %217 = arith.sitofp %216 : vector<1x64xi32> to vector<1x64xf32>
    %c13_106 = arith.constant 13 : index
    %c0_107 = arith.constant 0 : index
    %218 = vector.load %arg8[%c13_106, %c0_107] : memref<16x64xf32, #tpu.memory_space<vmem>>, vector<1x64xf32>
    tpu.vector_store %arg8[%c13_106, %c0_107], %217 {strides = array<i32>} : memref<16x64xf32, #tpu.memory_space<vmem>>, vector<1x64xf32>,
    %c14_108 = arith.constant 14 : index
    %219 = memref.load %arg2[%c14_108] : memref<16xi32, #tpu.memory_space<smem>>
    %c32_i32_109 = arith.constant 32 : i32
    %220 = arith.addi %219, %c32_i32_109 : i32
    %221 = vector.broadcast %220 : i32 to vector<1x64xi32>
    %222 = arith.cmpi eq, %120, %221 : vector<1x64xi32>
    %223 = arith.extui %222 : vector<1x64xi1> to vector<1x64xi32>
    %224 = arith.sitofp %223 : vector<1x64xi32> to vector<1x64xf32>
    %c14_110 = arith.constant 14 : index
    %c0_111 = arith.constant 0 : index
    %225 = vector.load %arg8[%c14_110, %c0_111] : memref<16x64xf32, #tpu.memory_space<vmem>>, vector<1x64xf32>
    tpu.vector_store %arg8[%c14_110, %c0_111], %224 {strides = array<i32>} : memref<16x64xf32, #tpu.memory_space<vmem>>, vector<1x64xf32>,
    %c15_112 = arith.constant 15 : index
    %226 = memref.load %arg2[%c15_112] : memref<16xi32, #tpu.memory_space<smem>>
    %c32_i32_113 = arith.constant 32 : i32
    %227 = arith.addi %226, %c32_i32_113 : i32
    %228 = vector.broadcast %227 : i32 to vector<1x64xi32>
    %229 = arith.cmpi eq, %120, %228 : vector<1x64xi32>
    %230 = arith.extui %229 : vector<1x64xi1> to vector<1x64xi32>
    %231 = arith.sitofp %230 : vector<1x64xi32> to vector<1x64xf32>
    %c15_114 = arith.constant 15 : index
    %c0_115 = arith.constant 0 : index
    %232 = vector.load %arg8[%c15_114, %c0_115] : memref<16x64xf32, #tpu.memory_space<vmem>>, vector<1x64xf32>
    tpu.vector_store %arg8[%c15_114, %c0_115], %231 {strides = array<i32>} : memref<16x64xf32, #tpu.memory_space<vmem>>, vector<1x64xf32>,
    %c0_116 = arith.constant 0 : index
    %c0_117 = arith.constant 0 : index
    %233 = vector.load %arg8[%c0_116, %c0_117] : memref<16x64xf32, #tpu.memory_space<vmem>>, vector<16x64xf32>
    %c0_118 = arith.constant 0 : index
    %c0_119 = arith.constant 0 : index
    %234 = vector.load %arg4[%c0_118, %c0_119] : memref<64x128xf32, #tpu.memory_space<vmem>>, vector<64x128xf32>
    %cst_120 = arith.constant dense<0.000000e+00> : vector<16x128xf32>
    %235 = tpu.matmul %233, %234, %cst_120 {dimension_numbers = #tpu.dot_dimension_numbers<[1], [0], [0], [1], [0, 0, 1, 1], [], []>} : vector<16x64xf32>, vector<64x128xf32>, vector<16x128xf32> -> vector<16x128xf32>
    %236 = vector.extract_strided_slice %235 {offsets = [0, 0], sizes = [8, 128], strides = [1, 1]} : vector<16x128xf32> to vector<8x128xf32>
    %c0_121 = arith.constant 0 : index
    %c0_122 = arith.constant 0 : index
    %237 = vector.load %arg6[%c0_121, %c0_122] : memref<8x256xf32, #tpu.memory_space<vmem>>, vector<8x128xf32>
    tpu.vector_store %arg6[%c0_121, %c0_122], %236 {strides = array<i32>} : memref<8x256xf32, #tpu.memory_space<vmem>>, vector<8x128xf32>,
    %238 = vector.extract_strided_slice %235 {offsets = [8, 0], sizes = [8, 128], strides = [1, 1]} : vector<16x128xf32> to vector<8x128xf32>
    %c0_123 = arith.constant 0 : index
    %c128_124 = arith.constant 128 : index
    %239 = vector.load %arg6[%c0_123, %c128_124] : memref<8x256xf32, #tpu.memory_space<vmem>>, vector<8x128xf32>
    tpu.vector_store %arg6[%c0_123, %c128_124], %238 {strides = array<i32>} : memref<8x256xf32, #tpu.memory_space<vmem>>, vector<8x128xf32>,
    return
  }
  func.func @transform_0(%arg0: i32, %arg1: memref<16xi32, #tpu.memory_space<smem>>, %arg2: memref<16xi32, #tpu.memory_space<smem>>) -> (i32, i32) {
    %c0_i32 = arith.constant 0 : i32
    %c0_i32_0 = arith.constant 0 : i32
    %c0_i32_1 = arith.constant 0 : i32
    return %c0_i32, %c0_i32_0 : i32, i32
  }
  func.func @transform_1(%arg0: i32, %arg1: memref<16xi32, #tpu.memory_space<smem>>, %arg2: memref<16xi32, #tpu.memory_space<smem>>) -> (i32, i32) {
    %c0_i32 = arith.constant 0 : i32
    %c0_i32_0 = arith.constant 0 : i32
    %c0_i32_1 = arith.constant 0 : i32
    return %c0_i32, %c0_i32_0 : i32, i32
  }
  func.func @transform_2(%arg0: i32, %arg1: memref<16xi32, #tpu.memory_space<smem>>, %arg2: memref<16xi32, #tpu.memory_space<smem>>) -> (i32, i32) {
    %c0_i32 = arith.constant 0 : i32
    %c0_i32_0 = arith.constant 0 : i32
    %c0_i32_1 = arith.constant 0 : i32
    return %c0_i32, %c0_i32_0 : i32, i32
  }
  func.func @transform_3(%arg0: i32, %arg1: memref<16xi32, #tpu.memory_space<smem>>, %arg2: memref<16xi32, #tpu.memory_space<smem>>) -> (i32, i32) {
    %c0_i32 = arith.constant 0 : i32
    %c0_i32_0 = arith.constant 0 : i32
    %c0_i32_1 = arith.constant 0 : i32
    return %c0_i32, %c0_i32_0 : i32, i32
  }
}

</mosaic_0001>

<bundles_post_ra>
// kernel: tpu_custom_call.1
= control target key start
LH: loop header
LB: loop body
LE: loop exit
PB: predicated region body
PF: predicated region fallthrough
CT: control target
= control target key end

     0   :  { %s748_s18 = smov [#allocation5]   ;;  %s976_s0 = inlined_call_operand.hbm [shape: s32[16], index: 0, kind: input, shape index: {}]   ;;  %s977_s2 = inlined_call_operand.hbm [shape: f32[128,128], index: 2, kind: input, shape index: {}]   ;;  %s978_s3 = inlined_call_operand.hbm [shape: f32[64,128], index: 3, kind: input, shape index: {}]   ;;  %s979_s4 = inlined_call_operand.hbm [shape: f32[8,256], index: 4, kind: output, shape index: {0}]   ;;  %s980_s5 = inlined_call_operand.hbm [shape: f32[8,256], index: 5, kind: output, shape index: {1}]   ;;  %s981_s1 = inlined_call_operand.vmem [shape: s32[16], index: 1, kind: input, shape index: {}]  }
   0x1   :  { %12 = dma.hbm_to_smem %s976_s0, 16, %s748_s18, [#allocation4] }
   0x2   :  { %s13_s23 = sshll.u32 %s981_s1, 4  ;;  %s14_s23 = int_to_ptr.vmem [resolvable:$true] %s13_s23 }
   0x3   :  { %s646_s24 = scalar_lea.vmem %s14_s23, 16  ;;  %p651_p1 = scmp.lt.s32.totalorder %s14_s23, %s14_s23 }
   0x4   :  { %p647_p0 = scmp.ne.s32.totalorder %s14_s23, %s646_s24  ;;  %p652_p2 = scmp.lt.s32.totalorder %s646_s24, %s646_s24 }
   0x6   :  { %p653_p3 = por %p652_p2, %p651_p1 }
   0x8   :  { %p654_p4 = pnand %p653_p3, %p647_p0 }
   0xa   :  { %657 = shalt.err (!%p654_p4)  }
   0xb   :  { %s749_s25 = smov [#allocation6]  }
   0xc   :  { %16 = dma.vmem_to_smem %s14_s23, 16, %s749_s25, [#allocation4] }
   0xd   :  { %738 = dma.done.wait [#allocation4], 32 }
   0xe   :  { %739 = vsyncadd [#allocation4], 4294967264 }
   0xf   :  { %18 = sfence }
  0x10   :  { %19 = vsyncpa [#allocation8], 0 }
  0x11   :  { %20 = vsyncpa [#allocation11], 0 }
  0x12   :  { %21 = vsyncpa [#allocation9], 0 }
  0x13   :  { %22 = vsyncpa [#allocation14], 0  ;;  %s750_s0 = smov [#allocation7]  }
  0x14   :  { %s28_s26 = sshll.u32 %s750_s0, 4  ;;  %s29_s26 = int_to_ptr.vmem [resolvable:$true] %s28_s26 }
  0x15   :  { %s666_s1 = scalar_lea.vmem %s29_s26, 2048  ;;  %p671_p6 = scmp.lt.s32.totalorder %s29_s26, %s29_s26 }
  0x16   :  { %p667_p5 = scmp.ne.s32.totalorder %s29_s26, %s666_s1  ;;  %p672_p7 = scmp.lt.s32.totalorder %s666_s1, %s666_s1 }
  0x18   :  { %p673_p8 = por %p672_p7, %p671_p6 }
  0x1a   :  { %p674_p9 = pnand %p673_p8, %p667_p5 }
  0x1c   :  { %677 = shalt.err (!%p674_p9)
}
  0x1d   :  { %s751_s27 = smov 128   ;;  %s752_s28 = smov 8  }
  0x1e   :  { %34 = dma.hbm_to_vmem [thread:$0]  %s977_s2, 2048, %s29_s26, [#allocation8], %s751_s27, %s751_s27, %s752_s28  }
  0x1f   :  { %s753_s6 = smov [#allocation10]  }
  0x20   :  { %s40_s7 = sshll.u32 %s753_s6, 4  ;;  %s41_s7 = int_to_ptr.vmem [resolvable:$true] %s40_s7 }
  0x21   :  { %s686_s8 = scalar_lea.vmem %s41_s7, 1024  ;;  %p691_p11 = scmp.lt.s32.totalorder %s41_s7, %s41_s7 }
  0x22   :  { %p687_p10 = scmp.ne.s32.totalorder %s41_s7, %s686_s8  ;;  %p692_p12 = scmp.lt.s32.totalorder %s686_s8, %s686_s8 }
  0x24   :  { %p693_p13 = por %p692_p12, %p691_p11 }
  0x26   :  { %p694_p0 = pnand %p693_p13, %p687_p10 }
  0x28   :  { %697 = shalt.err (!%p694_p0)
}
  0x29   :  { %46 = dma.hbm_to_vmem [thread:$0]  %s978_s3, 1024, %s41_s7, [#allocation11], %s751_s27, %s751_s27, %s752_s28  }
  0x2a   :  { %740 = dma.done.wait [#allocation8], 2048  }
  0x2b   :  { %741 = vsyncadd [#allocation8], 4294965248 }
  0x2c   :  { %742 = dma.done.wait [#allocation11], 1024  }
  0x2d   :  { %743 = vsyncadd [#allocation11], 4294966272  ;;  %v53_v0 = vlaneseq  ;;  %s254_s2 = sld [smem:[#allocation6]]  ;;  %v176_v2 = vld [vmem:[#allocation7 + $0x78] sm:$0xff]  ;;  %v175_v3 = vld [vmem:[#allocation7 + $0x70] sm:$0xff]  ;;  %vm259_vm0 = vcmask 516096  }
  0x2e   :  { %s515_s11 = sld [smem:[#allocation6 + $0x1]]  ;;  %575 = vmatprep.subr.mxu0 %v176_v2  ;;  %v174_v6 = vld [vmem:[#allocation7 + $0x68] sm:$0xff]  ;;  %v368_v7 = vld [vmem:[#allocation10 + $0x38] sm:$0xff]  ;;  %v754_v8 = vmov 0.0   ;;  %v367_v11 = vld [vmem:[#allocation10 + $0x30] sm:$0xff]  ;;  %vm369_vm14 = vcmask 523264  }
  0x2f   :  { %s517_s12 = sld [smem:[#allocation6 + $0x2]]  ;;  %v799_v1 = vand.u32 127, %v53_v0  ;;  %576 = vmatpush3.msra.mxu0 %v176_v2  ;;  %610 = vmatprep.subr.mxu1 %v368_v7  ;;  %v173_v14 = vld [vmem:[#allocation7 + $0x60] sm:$0xff]  ;;  %v366_v15 = vld [vmem:[#allocation10 + $0x28] sm:$0xff]  ;;  %v172_v20 = vld [vmem:[#allocation7 + $0x58] sm:$0xff] }
  0x30   :  { %s801_s13 = sld [smem:[#allocation6 + $0x3]]  ;;  %577 = vmatprep.subr.mxu0 %v175_v3  ;;  %611 = vmatpush3.msra.mxu1 %v368_v7  ;;  %v365_v21 = vld [vmem:[#allocation10 + $0x20] sm:$0xff]  ;;  %v171_v26 = vld [vmem:[#allocation7 + $0x50] sm:$0xff]  ;;  %v364_v27 = vld [vmem:[#allocation10 + $0x18] sm:$0xff] }
  0x31   :  { %s803_s14 = sld [smem:[#allocation6 + $0x4]]  ;;  %578 = vmatpush3.msra.mxu0 %v175_v3  ;;  %612 = vmatprep.subr.mxu1 %v367_v11  ;;  %v170_v31 = vld [vmem:[#allocation7 + $0x48] sm:$0xff]  ;;  %v363_v32 = vld [vmem:[#allocation10 + $0x10] sm:$0xff]  ;;  %v169_v36 = vld [vmem:[#allocation7 + $0x40] sm:$0xff] }
  0x32   :  { %s805_s15 = sld [smem:[#allocation6 + $0x5]]  ;;  %579 = vmatprep.subr.mxu0 %v174_v6  ;;  %613 = vmatpush3.msra.mxu1 %v367_v11  ;;  %v362_v37 = vld [vmem:[#allocation10 + $0x8] sm:$0xff]  ;;  %v168_v42 = vld [vmem:[#allocation7 + $0x38] sm:$0xff]  ;;  %v361_v43 = vld [vmem:[#allocation10] sm:$0xff] }
  0x33   :  { %v255_v4 = vstv %s254_s2  ;;  %s807_s3 = sld [smem:[#allocation6 + $0x6]]  ;;  %580 = vmatpush3.msra.mxu0 %v174_v6  ;;  %614 = vmatprep.subr.mxu1 %v366_v15  ;;  %v167_v48 = vld [vmem:[#allocation7 + $0x30] sm:$0xff]  ;;  %v166_v55 = vld [vmem:[#allocation7 + $0x28] sm:$0xff]  ;;  %v165_v61 = vld [vmem:[#allocation7 + $0x20] sm:$0xff] }
  0x34   :  { %vm256_vm1 = vcmp.eq.s32.totalorder %v799_v1, %v255_v4  ;;  %v262_v5 = vstv %s515_s11  ;;  %s810_s16 = sld [smem:[#allocation6 + $0x7]]  ;;  %581 = vmatprep.subr.mxu0 %v173_v14  ;;  %615 = vmatpush3.msra.mxu1 %v366_v15  ;;  %v164_v3 = vld [vmem:[#allocation7 + $0x18] sm:$0xff] }
  0x35   :  { %v514_v9 = vsel %vm256_vm1, 1.0, %v754_v8  ;;  %vm263_vm2 = vcmp.eq.s32.totalorder %v799_v1, %v262_v5  ;;  %v268_v10 = vstv %s517_s12  ;;  %s814_s17 = sld [smem:[#allocation6 + $0x8]]  ;;  %582 = vmatpush3.msra.mxu0 %v173_v14  ;;  %616 = vmatprep.subr.mxu1 %v365_v21 }
  0x36   :  { %260 = vst.msk [vmem:[#allocation3] sm:$0x1] %vm259_vm0, %v514_v9  ;;  %v516_v12 = vsel %vm263_vm2, 1.0, %v754_v8  ;;  %vm269_vm3 = vcmp.eq.s32.totalorder %v799_v1, %v268_v10  ;;  %v274_v13 = vstv %s801_s13  ;;  %s820_s18 = sld [smem:[#allocation6 + $0x9]]  ;;  %583 = vmatprep.subr.mxu0 %v172_v20  ;;  %617 = vmatpush3.msra.mxu1 %v365_v21  ;;  %v163_v9 = vld [vmem:[#allocation7 + $0x10] sm:$0xff] }
  0x37   :  { %266 = vst.msk [vmem:[#allocation3 + $0x1] sm:$0x1] %vm259_vm0, %v516_v12  ;;  %v518_v16 = vsel %vm269_vm3, 1.0, %v754_v8  ;;  %vm275_vm4 = vcmp.eq.s32.totalorder %v799_v1, %v274_v13  ;;  %v280_v17 = vstv %s803_s14  ;;  %s826_s19 = sld [smem:[#allocation6 + $0xa]]  ;;  %584 = vmatpush3.msra.mxu0 %v172_v20  ;;  %618 = vmatprep.subr.mxu1 %v364_v27  ;;  %v162_v13 = vld [vmem:[#allocation7 + $0x8] sm:$0xff] }
  0x38   :  { %272 = vst.msk [vmem:[#allocation3 + $0x2] sm:$0x1] %vm259_vm0, %v518_v16  ;;  %v520_v18 = vsel %vm275_vm4, 1.0, %v754_v8  ;;  %vm281_vm5 = vcmp.eq.s32.totalorder %v799_v1, %v280_v17  ;;  %v286_v19 = vstv %s805_s15  ;;  %s832_s20 = sld [smem:[#allocation6 + $0xb]]  ;;  %585 = vmatprep.subr.mxu0 %v171_v26  ;;  %619 = vmatpush3.msra.mxu1 %v364_v27 }
  0x39   :  { %278 = vst.msk [vmem:[#allocation3 + $0x3] sm:$0x1] %vm259_vm0, %v520_v18  ;;  %v522_v22 = vsel %vm281_vm5, 1.0, %v754_v8  ;;  %vm287_vm6 = vcmp.eq.s32.totalorder %v799_v1, %v286_v19  ;;  %v292_v23 = vstv %s807_s3  ;;  %s838_s21 = sld [smem:[#allocation6 + $0xc]]  ;;  %586 = vmatpush3.msra.mxu0 %v171_v26  ;;  %620 = vmatprep.subr.mxu1 %v363_v32  ;;  %v161_v18 = vld [vmem:[#allocation7] sm:$0xff] }
  0x3a   :  { %284 = vst.msk [vmem:[#allocation3 + $0x4] sm:$0x1] %vm259_vm0, %v522_v22  ;;  %v524_v24 = vsel %vm287_vm6, 1.0, %v754_v8  ;;  %vm293_vm7 = vcmp.eq.s32.totalorder %v799_v1, %v292_v23  ;;  %v298_v25 = vstv %s810_s16  ;;  %s844_s22 = sld [smem:[#allocation6 + $0xd]]  ;;  %587 = vmatprep.subr.mxu0 %v170_v31  ;;  %621 = vmatpush3.msra.mxu1 %v363_v32 }
  0x3b   :  { %290 = vst.msk [vmem:[#allocation3 + $0x5] sm:$0x1] %vm259_vm0, %v524_v24  ;;  %v526_v28 = vsel %vm293_vm7, 1.0, %v754_v8  ;;  %vm299_vm8 = vcmp.eq.s32.totalorder %v799_v1, %v298_v25  ;;  %s304_s23 = sadd.s32 32, %s814_s17  ;;  %s850_s24 = sld [smem:[#allocation6 + $0xe]]  ;;  %588 = vmatpush3.msra.mxu0 %v170_v31  ;;  %622 = vmatprep.subr.mxu1 %v362_v37 }
  0x3c   :  { %296 = vst.msk [vmem:[#allocation3 + $0x6] sm:$0x1] %vm259_vm0, %v526_v28  ;;  %v528_v29 = vsel %vm299_vm8, 1.0, %v754_v8  ;;  %v305_v30 = vstv %s304_s23  ;;  %s311_s25 = sadd.s32 32, %s820_s18  ;;  %s855_s0 = sld [smem:[#allocation6 + $0xf]]  ;;  %589 = vmatprep.subr.mxu0 %v169_v36  ;;  %623 = vmatpush3.msra.mxu1 %v362_v37 }
  0x3d   :  { %302 = vst.msk [vmem:[#allocation3 + $0x7] sm:$0x1] %vm259_vm0, %v528_v29  ;;  %vm306_vm9 = vcmp.eq.s32.totalorder %v799_v1, %v305_v30  ;;  %v312_v33 = vstv %s311_s25  ;;  %s318_s26 = sadd.s32 32, %s826_s19  ;;  %s860_s1 = sld [smem:[#allocation5]]  ;;  %590 = vmatpush3.msra.mxu0 %v169_v36  ;;  %624 = vmatprep.subr.mxu1 %v361_v43 }
  0x3e   :  { %v530_v34 = vsel %vm306_vm9, 1.0, %v754_v8  ;;  %vm313_vm10 = vcmp.eq.s32.totalorder %v799_v1, %v312_v33  ;;  %v319_v35 = vstv %s318_s26  ;;  %s325_s27 = sadd.s32 32, %s832_s20  ;;  %s865_s28 = sld [smem:[#allocation5 + $0x1]]  ;;  %591 = vmatprep.subr.mxu0 %v168_v42  ;;  %625 = vmatpush3.msra.mxu1 %v361_v43 }
  0x3f   :  { %309 = vst.msk [vmem:[#allocation3 + $0x8] sm:$0x1] %vm259_vm0, %v530_v34  ;;  %v532_v38 = vsel %vm313_vm10, 1.0, %v754_v8  ;;  %vm320_vm11 = vcmp.eq.s32.totalorder %v799_v1, %v319_v35  ;;  %v326_v39 = vstv %s325_s27  ;;  %s332_s29 = sadd.s32 32, %s838_s21  ;;  %s871_s30 = sld [smem:[#allocation5 + $0x2]]  ;;  %592 = vmatpush3.msra.mxu0 %v168_v42 }
  0x40   :  { %316 = vst.msk [vmem:[#allocation3 + $0x9] sm:$0x1] %vm259_vm0, %v532_v38  ;;  %v534_v40 = vsel %vm320_vm11, 1.0, %v754_v8  ;;  %vm327_vm12 = vcmp.eq.s32.totalorder %v799_v1, %v326_v39  ;;  %v333_v41 = vstv %s332_s29  ;;  %s339_s6 = sadd.s32 32, %s844_s22  ;;  %s877_s7 = sld [smem:[#allocation5 + $0x3]]  ;;  %593 = vmatprep.subr.mxu0 %v167_v48 }
  0x41   :  { %323 = vst.msk [vmem:[#allocation3 + $0xa] sm:$0x1] %vm259_vm0, %v534_v40  ;;  %v536_v44 = vsel %vm327_vm12, 1.0, %v754_v8  ;;  %vm334_vm13 = vcmp.eq.s32.totalorder %v799_v1, %v333_v41  ;;  %v340_v45 = vstv %s339_s6  ;;  %s346_s8 = sadd.s32 32, %s850_s24  ;;  %s883_s9 = sld [smem:[#allocation5 + $0x4]]  ;;  %594 = vmatpush3.msra.mxu0 %v167_v48 }
  0x42   :  { %330 = vst.msk [vmem:[#allocation3 + $0xb] sm:$0x1] %vm259_vm0, %v536_v44  ;;  %v538_v46 = vsel %vm334_vm13, 1.0, %v754_v8  ;;  %vm341_vm15 = vcmp.eq.s32.totalorder %v799_v1, %v340_v45  ;;  %v347_v47 = vstv %s346_s8  ;;  %s353_s10 = sadd.s32 32, %s855_s0  ;;  %s889_s2 = sld [smem:[#allocation5 + $0x5]]  ;;  %595 = vmatprep.subr.mxu0 %v166_v55 }
  0x43   :  { %337 = vst.msk [vmem:[#allocation3 + $0xc] sm:$0x1] %vm259_vm0, %v538_v46  ;;  %v540_v49 = vsel %vm341_vm15, 1.0, %v754_v8  ;;  %vm348_vm1 = vcmp.eq.s32.totalorder %v799_v1, %v347_v47  ;;  %v354_v50 = vstv %s353_s10  ;;  %v56_v51 = vstv %s860_s1  ;;  %s895_s11 = sld [smem:[#allocation5 + $0x6]]  ;;  %596 = vmatpush3.msra.mxu0 %v166_v55  ;;  %s755_s1 = smov [#allocation13]  }
  0x44   :  { %v359_v52 = vld [vmem:[#allocation3] sm:$0xff]  ;;  %344 = vst.msk [vmem:[#allocation3 + $0xd] sm:$0x1] %vm259_vm0, %v540_v49  ;;  %v542_v53 = vsel %vm348_vm1, 1.0, %v754_v8  ;;  %vm355_vm2 = vcmp.eq.s32.totalorder %v799_v1, %v354_v50  ;;  %vm57_vm3 = vcmp.eq.s32.totalorder %v799_v1, %v56_v51  ;;  %v62_v54 = vstv %s865_s28  ;;  %s902_s12 = sld [smem:[#allocation5 + $0x7]]  ;;  %597 = vmatprep.subr.mxu0 %v165_v61  ;;  %s469_s27 = sshll.u32 %s755_s1, 4  ;;  %s470_s27 = int_to_ptr.vmem [resolvable:$true] %s469_s27 }
  0x45   :  { %351 = vst.msk [vmem:[#allocation3 + $0xe] sm:$0x1] %vm259_vm0, %v542_v53  ;;  %v544_v56 = vsel %vm355_vm2, 1.0, %v754_v8  ;;  %v483_v57 = vsel %vm57_vm3, 1.0, %v754_v8  ;;  %vm63_vm4 = vcmp.eq.s32.totalorder %v799_v1, %v62_v54  ;;  %v68_v58 = vstv %s871_s30  ;;  %s909_s13 = sld [smem:[#allocation5 + $0x8]]  ;;  %626 = vmatprep.mubr.msk.f32.mxu1 %vm369_vm14, %v359_v52  ;;  %598 = vmatpush3.msra.mxu0 %v165_v61  ;;  %s698_s28 = scalar_lea.vmem %s470_s27, 256 }
  0x46   :  { %358 = vst.msk [vmem:[#allocation3 + $0xf] sm:$0x1] %vm259_vm0, %v544_v56  ;;  %60 = vst [vmem:[#allocation2] sm:$0x1] %v483_v57  ;;  %v485_v59 = vsel %vm63_vm4, 1.0, %v754_v8  ;;  %vm69_vm5 = vcmp.eq.s32.totalorder %v799_v1, %v68_v58  ;;  %v74_v60 = vstv %s877_s7  ;;  %s916_s14 = sld [smem:[#allocation5 + $0x9]]  ;;  %599 = vmatprep.subr.mxu0 %v164_v3  ;;  %p699_p1 = scmp.ne.s32.totalorder %s470_s27, %s698_s28 }
  0x47   :  { %66 = vst [vmem:[#allocation2 + $0x1] sm:$0x1] %v485_v59  ;;  %v487_v62 = vsel %vm69_vm5, 1.0, %v754_v8  ;;  %vm75_vm6 = vcmp.eq.s32.totalorder %v799_v1, %v74_v60  ;;  %v80_v63 = vstv %s883_s9  ;;  %s921_s15 = sld [smem:[#allocation5 + $0xa]]  ;;  %600 = vmatpush3.msra.mxu0 %v164_v3  ;;  %p703_p2 = scmp.lt.s32.totalorder %s470_s27, %s470_s27 }
  0x48   :  { %72 = vst [vmem:[#allocation2 + $0x2] sm:$0x1] %v487_v62  ;;  %v489_v0 = vsel %vm75_vm6, 1.0, %v754_v8  ;;  %vm81_vm0 = vcmp.eq.s32.totalorder %v799_v1, %v80_v63  ;;  %v86_v2 = vstv %s889_s2  ;;  %s926_s3 = sld [smem:[#allocation5 + $0xb]]  ;;  %601 = vmatprep.subr.mxu0 %v163_v9  ;;  %p704_p3 = scmp.lt.s32.totalorder %s698_s28, %s698_s28 }
  0x49   :  { %78 = vst [vmem:[#allocation2 + $0x3] sm:$0x1] %v489_v0  ;;  %v491_v4 = vsel %vm81_vm0, 1.0, %v754_v8  ;;  %vm87_vm7 = vcmp.eq.s32.totalorder %v799_v1, %v86_v2  ;;  %v92_v5 = vstv %s895_s11  ;;  %s931_s16 = sld [smem:[#allocation5 + $0xc]]  ;;  %602 = vmatpush3.msra.mxu0 %v163_v9 }
  0x4a   :  { %84 = vst [vmem:[#allocation2 + $0x4] sm:$0x1] %v491_v4  ;;  %v493_v6 = vsel %vm87_vm7, 1.0, %v754_v8  ;;  %vm93_vm8 = vcmp.eq.s32.totalorder %v799_v1, %v92_v5  ;;  %v98_v7 = vstv %s902_s12  ;;  %s936_s17 = sld [smem:[#allocation5 + $0xd]]  ;;  %603 = vmatprep.subr.mxu0 %v162_v13  ;;  %p705_p4 = por %p704_p3, %p703_p2 }
  0x4b   :  { %90 = vst [vmem:[#allocation2 + $0x5] sm:$0x1] %v493_v6  ;;  %v495_v10 = vsel %vm93_vm8, 1.0, %v754_v8  ;;  %vm99_vm9 = vcmp.eq.s32.totalorder %v799_v1, %v98_v7  ;;  %s104_s18 = sadd.s32 64, %s909_s13  ;;  %s941_s19 = sld [smem:[#allocation5 + $0xe]]  ;;  %604 = vmatpush3.msra.mxu0 %v162_v13 }
  0x4c   :  { %96 = vst [vmem:[#allocation2 + $0x6] sm:$0x1] %v495_v10  ;;  %v497_v11 = vsel %vm99_vm9, 1.0, %v754_v8  ;;  %v105_v12 = vstv %s104_s18  ;;  %s111_s20 = sadd.s32 64, %s916_s14  ;;  %s945_s21 = sld [smem:[#allocation5 + $0xf]]  ;;  %605 = vmatprep.subr.mxu0 %v161_v18 }
  0x4d   :  { %v360_v14 = vld [vmem:[#allocation3 + $0x8] sm:$0xff]  ;;  %102 = vst [vmem:[#allocation2 + $0x7] sm:$0x1] %v497_v11  ;;  %vm106_vm10 = vcmp.eq.s32.totalorder %v799_v1, %v105_v12  ;;  %v112_v15 = vstv %s111_s20  ;;  %s118_s22 = sadd.s32 64, %s921_s15  ;;  %606 = vmatpush3.msra.mxu0 %v161_v18  ;;  %p706_p5 = pnand %p705_p4, %p699_p1 }
  0x4e   :  { %627 = vmatmul.mubr.msk.f32.vlgmr.msra.gmra.mxu1 %vm369_vm14, %v360_v14  ;;  %v499_v16 = vsel %vm106_vm10, 1.0, %v754_v8  ;;  %vm113_vm11 = vcmp.eq.s32.totalorder %v799_v1, %v112_v15  ;;  %v119_v17 = vstv %s118_s22  ;;  %s125_s23 = sadd.s32 64, %s926_s3 }
  0x4f   :  { %109 = vst [vmem:[#allocation2 + $0x8] sm:$0x1] %v499_v16  ;;  %v501_v19 = vsel %vm113_vm11, 1.0, %v754_v8  ;;  %vm120_vm12 = vcmp.eq.s32.totalorder %v799_v1, %v119_v17  ;;  %v126_v20 = vstv %s125_s23  ;;  %s132_s24 = sadd.s32 64, %s931_s16 }
  0x50   :  { %116 = vst [vmem:[#allocation2 + $0x9] sm:$0x1] %v501_v19  ;;  %v503_v21 = vsel %vm120_vm12, 1.0, %v754_v8  ;;  %vm127_vm13 = vcmp.eq.s32.totalorder %v799_v1, %v126_v20  ;;  %v133_v22 = vstv %s132_s24  ;;  %s139_s25 = sadd.s32 64, %s936_s17 }
  0x51   :  { %123 = vst [vmem:[#allocation2 + $0xa] sm:$0x1] %v503_v21  ;;  %v505_v23 = vsel %vm127_vm13, 1.0, %v754_v8  ;;  %vm134_vm14 = vcmp.eq.s32.totalorder %v799_v1, %v133_v22  ;;  %v140_v24 = vstv %s139_s25  ;;  %s146_s0 = sadd.s32 64, %s941_s19 }
  0x52   :  { %130 = vst [vmem:[#allocation2 + $0xb] sm:$0x1] %v505_v23  ;;  %v507_v25 = vsel %vm134_vm14, 1.0, %v754_v8  ;;  %vm141_vm15 = vcmp.eq.s32.totalorder %v799_v1, %v140_v24  ;;  %v147_v26 = vstv %s146_s0  ;;  %s153_s26 = sadd.s32 64, %s945_s21 }
  0x53   :  { %137 = vst [vmem:[#allocation2 + $0xc] sm:$0x1] %v507_v25  ;;  %v509_v27 = vsel %vm141_vm15, 1.0, %v754_v8  ;;  %vm148_vm1 = vcmp.eq.s32.totalorder %v799_v1, %v147_v26  ;;  %v154_v28 = vstv %s153_s26 }
  0x54   :  { %v159_v29 = vld [vmem:[#allocation2] sm:$0xff]  ;;  %144 = vst [vmem:[#allocation2 + $0xd] sm:$0x1] %v509_v27  ;;  %v511_v30 = vsel %vm148_vm1, 1.0, %v754_v8  ;;  %vm155_vm2 = vcmp.eq.s32.totalorder %v799_v1, %v154_v28 }
  0x55   :  { %607 = vmatprep.mubr.f32.mxu0 %v159_v29  ;;  %151 = vst [vmem:[#allocation2 + $0xe] sm:$0x1] %v511_v30  ;;  %v513_v31 = vsel %vm155_vm2, 1.0, %v754_v8 }
  0x56   :  { %158 = vst [vmem:[#allocation2 + $0xf] sm:$0x1] %v513_v31 }
  0x5d   :  { %v160_v32 = vld [vmem:[#allocation2 + $0x8] sm:$0xff] }
  0x5e   :  { %608 = vmatmul.mubr.f32.vlgmr.msra.gmra.mxu0 %v160_v32 }
 0x10e   :  { %v628_v33 = vpop.f32.mrf.mxu1 }
 0x10f   :  { %452 = vst [vmem:[#allocation13 + $0x8] sm:$0xff] %v628_v33 }
 0x110   :  { %v442_v34 = vpop.f32.mrf.mxu1 }
 0x111   :  { %451 = vst [vmem:[#allocation13] sm:$0xff] %v442_v34 }
 0x112   :  { %709 = shalt.err (!%p706_p5)
}
 0x113   :  { %472 = dma.vmem_to_hbm [thread:$0]  %s470_s27, 256, %s980_s5, [#allocation14]  }
 0x114   :  { %s756_s6 = smov [#allocation12]  }
 0x115   :  { %s459_s7 = sshll.u32 %s756_s6, 4  ;;  %s460_s7 = int_to_ptr.vmem [resolvable:$true] %s459_s7 }
 0x116   :  { %s718_s8 = scalar_lea.vmem %s460_s7, 256  ;;  %p723_p7 = scmp.lt.s32.totalorder %s460_s7, %s460_s7 }
 0x117   :  { %p719_p6 = scmp.ne.s32.totalorder %s460_s7, %s718_s8  ;;  %p724_p8 = scmp.lt.s32.totalorder %s718_s8, %s718_s8 }
 0x119   :  { %p725_p9 = por %p724_p8, %p723_p7 }
 0x11b   :  { %p726_p10 = pnand %p725_p9, %p719_p6 }
 0x11e   :  { %v609_v1 = vpop.f32.mrf.mxu0 }
 0x11f   :  { %253 = vst [vmem:[#allocation12 + $0x8] sm:$0xff] %v609_v1 }
 0x120   :  { %v243_v8 = vpop.f32.mrf.mxu0 }
 0x121   :  { %252 = vst [vmem:[#allocation12] sm:$0xff] %v243_v8 }
 0x122   :  { %729 = shalt.err (!%p726_p10)
}
 0x123   :  { %462 = dma.vmem_to_hbm [thread:$0]  %s460_s7, 256, %s979_s4, [#allocation9]  }
 0x124   :  { %744 = dma.done.wait [#allocation9], 256  }
 0x125   :  { %745 = vsyncadd [#allocation9], 4294967040 }
 0x126   :  { %746 = dma.done.wait [#allocation14], 256  }
 0x127   :  { %747 = vsyncadd [#allocation14], 4294967040 }
 0x128   :  { %479 = vsyncpa [#allocation8], 1 }
 0x129   :  { %480 = vsyncpa [#allocation11], 1 }
 0x12a   :  { %481 = vsyncpa [#allocation9], 1 }
 0x12b   :  { %482 = vsyncpa [#allocation14], 1 }

</bundles_post_ra>
